<compile_context>
chip_gen: v5e
topology: v5e:2x2
jax: 0.10.0
libtpu: 0.0.40
codegen_flags: <defaults>
</compile_context>

<pallas_src>
import math

import jax
import jax.numpy as jnp
import numpy as np
from jax.experimental import pallas as pl
from jax.experimental.pallas import tpu as pltpu  # noqa: F401  (TPU backend / kept for future use)

# ---- problem sizes (consistent with the module) ----
SEQ = 8          # L
BATCH = 2        # N
EMBED = 32       # input_dim (divisible by num_heads=8)
HIDDEN = 16      # hidden_dim
NUM_HEADS = 8
HEAD_DIM = EMBED // NUM_HEADS


def _attention_block_kernel(x_ref, wqkv_ref, bqkv_ref, wout_ref, bout_ref, out_ref):
    """Single invocation.  x_ref: (N*L, E); out_ref: (N*L, HIDDEN)."""
    x = x_ref[...]                                                        # (16, 32)

    # --- fused Q/K/V in-projection: one MXU pass (scale pre-folded into Q columns) ---
    qkv = jnp.dot(x, wqkv_ref[...], preferred_element_type=jnp.float32) + bqkv_ref[...]  # (16, 96)

    # (N*L, E) slices -> (N, L, E); reshapes only split the leading row dim (trivial relayout).
    q3 = qkv[:, :EMBED].reshape(BATCH, SEQ, EMBED)
    k3 = qkv[:, EMBED:2 * EMBED].reshape(BATCH, SEQ, EMBED)
    v3 = qkv[:, 2 * EMBED:].reshape(BATCH, SEQ, EMBED)

    # --- per-head attention, batched over the batch dim (single-batch-dim dot_generals) ---
    head_outs = []
    for h in range(NUM_HEADS):
        lo = h * HEAD_DIM
        hi = lo + HEAD_DIM
        qh = q3[:, :, lo:hi]                                              # (N, L, D)
        kh = k3[:, :, lo:hi]
        vh = v3[:, :, lo:hi]
        s = jnp.einsum('nld,nmd->nlm', qh, kh,
                       preferred_element_type=jnp.float32)                # (N, L, L)
        s = s - jnp.max(s, axis=-1, keepdims=True)
        p = jnp.exp(s)
        inv = pl.reciprocal(jnp.sum(p, axis=-1, keepdims=True), approx=True)  # EUP, (N, L, 1)
        o = jnp.einsum('nlm,nmd->nld', p, vh,
                       preferred_element_type=jnp.float32)                # (N, L, D)
        head_outs.append(o * inv)                                         # fold 1/sum into 4-lane output
    attn = jnp.concatenate(head_outs, axis=-1).reshape(BATCH * SEQ, EMBED)  # (16, 32)

    # --- fused (MHA out_proj  ∘  final fc): single matmul to HIDDEN ---
    y = jnp.dot(attn, wout_ref[...], preferred_element_type=jnp.float32) + bout_ref[...]  # (16, 16)
    out_ref[...] = y.astype(out_ref.dtype)


def attention_block_pallas(x_lne, params):
    """x_lne: (L, N, E) float32 (PyTorch MultiheadAttention default layout).
    Returns (L, N, HIDDEN)."""
    wq, wk, wv, bq, bk, bv, wo, bo, wfc, bfc = params
    L, N, E = x_lne.shape
    scale = 1.0 / math.sqrt(HEAD_DIM)

    # Host-side (trace-time XLA) weight fusion / pre-transposition.
    w_qkv = jnp.concatenate([wq.T * scale, wk.T, wv.T], axis=1)           # (E, 3E)
    b_qkv = jnp.concatenate([bq * scale, bk, bv], axis=0).reshape(1, 3 * E)  # (1, 3E)
    w_out = wo.T @ wfc.T                                                  # (E, HIDDEN)
    b_out = (bo @ wfc.T + bfc).reshape(1, HIDDEN)                         # (1, HIDDEN)

    # (L, N, E) -> (N*L, E) so the kernel sees one lane-/sublane-dense slab.
    x_flat = jnp.transpose(x_lne, (1, 0, 2)).reshape(N * L, E)

    out_flat = pl.pallas_call(
        _attention_block_kernel,
        out_shape=jax.ShapeDtypeStruct((N * L, HIDDEN), jnp.float32),
    )(x_flat, w_qkv, b_qkv, w_out, b_out)

    return jnp.transpose(out_flat.reshape(N, L, HIDDEN), (1, 0, 2))       # (L, N, HIDDEN)


def _reference(x_lne, params):
    """Pure-JAX reference replicating PyTorch MultiheadAttention (eval) + Linear, unfused."""
    wq, wk, wv, bq, bk, bv, wo, bo, wfc, bfc = params
    L, N, E = x_lne.shape
    q = x_lne @ wq.T + bq
    k = x_lne @ wk.T + bk
    v = x_lne @ wv.T + bv

    def split(t):  # (L, N, E) -> (N, H, L, D)
        return jnp.transpose(t.reshape(L, N, NUM_HEADS, HEAD_DIM), (1, 2, 0, 3))

    qh, kh, vh = split(q), split(k), split(v)
    scores = jnp.einsum('nhld,nhmd->nhlm', qh, kh) / math.sqrt(HEAD_DIM)
    p = jax.nn.softmax(scores, axis=-1)
    o = jnp.einsum('nhlm,nhmd->nhld', p, vh)
    o = jnp.transpose(o, (2, 0, 1, 3)).reshape(L, N, E)
    attn_out = o @ wo.T + bo
    return attn_out @ wfc.T + bfc


def init_params(key):
    """Parameters in PyTorch layout:
    in_proj (3E,E)+(3E,) split into q/k/v, out_proj Linear(E,E), fc Linear(E,HIDDEN)."""
    ks = jax.random.split(key, 8)
    s = 0.1
    wq = s * jax.random.normal(ks[0], (EMBED, EMBED), jnp.float32)
    wk = s * jax.random.normal(ks[1], (EMBED, EMBED), jnp.float32)
    wv = s * jax.random.normal(ks[2], (EMBED, EMBED), jnp.float32)
    bq = s * jax.random.normal(ks[3], (EMBED,), jnp.float32)
    bk = jnp.zeros((EMBED,), jnp.float32)
    bv = s * jax.random.normal(ks[4], (EMBED,), jnp.float32)
    wo = s * jax.random.normal(ks[5], (EMBED, EMBED), jnp.float32)
    bo = jnp.full((EMBED,), 0.01, jnp.float32)
    wfc = s * jax.random.normal(ks[6], (HIDDEN, EMBED), jnp.float32)
    bfc = jnp.full((HIDDEN,), -0.02, jnp.float32)
    return (wq, wk, wv, bq, bk, bv, wo, bo, wfc, bfc)


if __name__ == "__main__":
    key = jax.random.PRNGKey(0)
    kx, kp = jax.random.split(key)
    # x in PyTorch MultiheadAttention default layout: (seq, batch, embed)
    x = jax.random.normal(kx, (SEQ, BATCH, EMBED), jnp.float32)
    params = init_params(kp)

    run = jax.jit(attention_block_pallas)
    out = jax.block_until_ready(run(x, params))

    ref = _reference(x, params)
    # Tolerance relaxed vs. 1e-5: the kernel uses the EUP approximate reciprocal for the
    # softmax denominator and the algebraically fused out_proj∘fc weight (different fp
    # association); both introduce ~1e-4-scale deviations at most.
    np.testing.assert_allclose(np.asarray(out), np.asarray(ref), rtol=2e-3, atol=2e-3)
    assert out.shape == (SEQ, BATCH, HIDDEN)
    print("KERNEL_OK")
</pallas_src>

<mosaic_0001>
module attributes {stable_mosaic.version = 11 : i64} {
  func.func @_attention_block_kernel(%arg0: memref<16x32xf32, #tpu.memory_space<vmem>>, %arg1: memref<32x96xf32, #tpu.memory_space<vmem>>, %arg2: memref<1x96xf32, #tpu.memory_space<vmem>>, %arg3: memref<32x16xf32, #tpu.memory_space<vmem>>, %arg4: memref<1x16xf32, #tpu.memory_space<vmem>>, %arg5: memref<16x16xf32, #tpu.memory_space<vmem>>) attributes {dimension_semantics = [], scalar_prefetch = 0 : i64, scratch_operands = 0 : i64, tpu.core_type = #tpu.core_type<tc>} {
    %c0 = arith.constant 0 : index
    %c0_0 = arith.constant 0 : index
    %0 = vector.load %arg0[%c0, %c0_0] : memref<16x32xf32, #tpu.memory_space<vmem>>, vector<16x32xf32>
    %c0_1 = arith.constant 0 : index
    %c0_2 = arith.constant 0 : index
    %1 = vector.load %arg1[%c0_1, %c0_2] : memref<32x96xf32, #tpu.memory_space<vmem>>, vector<32x96xf32>
    %cst = arith.constant dense<0.000000e+00> : vector<16x96xf32>
    %2 = tpu.matmul %0, %1, %cst {dimension_numbers = #tpu.dot_dimension_numbers<[1], [0], [0], [1], [0, 0, 1, 1], [], []>} : vector<16x32xf32>, vector<32x96xf32>, vector<16x96xf32> -> vector<16x96xf32>
    %c0_3 = arith.constant 0 : index
    %c0_4 = arith.constant 0 : index
    %3 = vector.load %arg2[%c0_3, %c0_4] : memref<1x96xf32, #tpu.memory_space<vmem>>, vector<1x96xf32>
    %4 = vector.broadcast %3 : vector<1x96xf32> to vector<16x96xf32>
    %5 = arith.addf %2, %4 : vector<16x96xf32>
    %6 = vector.extract_strided_slice %5 {offsets = [0, 0], sizes = [16, 32], strides = [1, 1]} : vector<16x96xf32> to vector<16x32xf32>
    %7 = vector.shape_cast %6 : vector<16x32xf32> to vector<2x8x32xf32>
    %8 = vector.extract_strided_slice %5 {offsets = [0, 32], sizes = [16, 32], strides = [1, 1]} : vector<16x96xf32> to vector<16x32xf32>
    %9 = vector.shape_cast %8 : vector<16x32xf32> to vector<2x8x32xf32>
    %10 = vector.extract_strided_slice %5 {offsets = [0, 64], sizes = [16, 32], strides = [1, 1]} : vector<16x96xf32> to vector<16x32xf32>
    %11 = vector.shape_cast %10 : vector<16x32xf32> to vector<2x8x32xf32>
    %12 = vector.extract_strided_slice %7 {offsets = [0, 0, 0], sizes = [2, 8, 4], strides = [1, 1, 1]} : vector<2x8x32xf32> to vector<2x8x4xf32>
    %13 = vector.extract_strided_slice %9 {offsets = [0, 0, 0], sizes = [2, 8, 4], strides = [1, 1, 1]} : vector<2x8x32xf32> to vector<2x8x4xf32>
    %14 = vector.extract_strided_slice %11 {offsets = [0, 0, 0], sizes = [2, 8, 4], strides = [1, 1, 1]} : vector<2x8x32xf32> to vector<2x8x4xf32>
    "tpu.trace_start"() <{level = 10 : i32, message = "nld,nmd->nlm"}> : () -> ()
    %cst_5 = arith.constant dense<0.000000e+00> : vector<2x8x8xf32>
    %15 = tpu.matmul %12, %13, %cst_5 {dimension_numbers = #tpu.dot_dimension_numbers<[2], [2], [1], [1], [0, 0, 0, 1, 1, 1], [0], [0]>} : vector<2x8x4xf32>, vector<2x8x4xf32>, vector<2x8x8xf32> -> vector<2x8x8xf32>
    "tpu.trace_stop"() : () -> ()
    %cst_6 = arith.constant dense<0xFF800000> : vector<2x8xf32>
    %16 = vector.multi_reduction <maximumf>, %15, %cst_6 [2] : vector<2x8x8xf32> to vector<2x8xf32>
    %17 = vector.shape_cast %16 : vector<2x8xf32> to vector<2x8x1xf32>
    %18 = vector.broadcast %17 : vector<2x8x1xf32> to vector<2x8x8xf32>
    %19 = arith.subf %15, %18 : vector<2x8x8xf32>
    %20 = math.exp %19 : vector<2x8x8xf32>
    %cst_7 = arith.constant dense<0.000000e+00> : vector<2x8xf32>
    %21 = vector.multi_reduction <add>, %20, %cst_7 [2] : vector<2x8x8xf32> to vector<2x8xf32>
    %22 = vector.shape_cast %21 : vector<2x8xf32> to vector<2x8x1xf32>
    %23 = tpu.reciprocal %22 {approx = true} : vector<2x8x1xf32> -> vector<2x8x1xf32>
    "tpu.trace_start"() <{level = 10 : i32, message = "nlm,nmd->nld"}> : () -> ()
    %cst_8 = arith.constant dense<0.000000e+00> : vector<2x8x4xf32>
    %24 = tpu.matmul %20, %14, %cst_8 {dimension_numbers = #tpu.dot_dimension_numbers<[2], [1], [1], [2], [0, 0, 0, 1, 1, 2], [0], [0]>} : vector<2x8x8xf32>, vector<2x8x4xf32>, vector<2x8x4xf32> -> vector<2x8x4xf32>
    "tpu.trace_stop"() : () -> ()
    %25 = vector.broadcast %23 : vector<2x8x1xf32> to vector<2x8x4xf32>
    %26 = arith.mulf %24, %25 : vector<2x8x4xf32>
    %27 = vector.extract_strided_slice %7 {offsets = [0, 0, 4], sizes = [2, 8, 4], strides = [1, 1, 1]} : vector<2x8x32xf32> to vector<2x8x4xf32>
    %28 = vector.extract_strided_slice %9 {offsets = [0, 0, 4], sizes = [2, 8, 4], strides = [1, 1, 1]} : vector<2x8x32xf32> to vector<2x8x4xf32>
    %29 = vector.extract_strided_slice %11 {offsets = [0, 0, 4], sizes = [2, 8, 4], strides = [1, 1, 1]} : vector<2x8x32xf32> to vector<2x8x4xf32>
    "tpu.trace_start"() <{level = 10 : i32, message = "nld,nmd->nlm"}> : () -> ()
    %cst_9 = arith.constant dense<0.000000e+00> : vector<2x8x8xf32>
    %30 = tpu.matmul %27, %28, %cst_9 {dimension_numbers = #tpu.dot_dimension_numbers<[2], [2], [1], [1], [0, 0, 0, 1, 1, 1], [0], [0]>} : vector<2x8x4xf32>, vector<2x8x4xf32>, vector<2x8x8xf32> -> vector<2x8x8xf32>
    "tpu.trace_stop"() : () -> ()
    %cst_10 = arith.constant dense<0xFF800000> : vector<2x8xf32>
    %31 = vector.multi_reduction <maximumf>, %30, %cst_10 [2] : vector<2x8x8xf32> to vector<2x8xf32>
    %32 = vector.shape_cast %31 : vector<2x8xf32> to vector<2x8x1xf32>
    %33 = vector.broadcast %32 : vector<2x8x1xf32> to vector<2x8x8xf32>
    %34 = arith.subf %30, %33 : vector<2x8x8xf32>
    %35 = math.exp %34 : vector<2x8x8xf32>
    %cst_11 = arith.constant dense<0.000000e+00> : vector<2x8xf32>
    %36 = vector.multi_reduction <add>, %35, %cst_11 [2] : vector<2x8x8xf32> to vector<2x8xf32>
    %37 = vector.shape_cast %36 : vector<2x8xf32> to vector<2x8x1xf32>
    %38 = tpu.reciprocal %37 {approx = true} : vector<2x8x1xf32> -> vector<2x8x1xf32>
    "tpu.trace_start"() <{level = 10 : i32, message = "nlm,nmd->nld"}> : () -> ()
    %cst_12 = arith.constant dense<0.000000e+00> : vector<2x8x4xf32>
    %39 = tpu.matmul %35, %29, %cst_12 {dimension_numbers = #tpu.dot_dimension_numbers<[2], [1], [1], [2], [0, 0, 0, 1, 1, 2], [0], [0]>} : vector<2x8x8xf32>, vector<2x8x4xf32>, vector<2x8x4xf32> -> vector<2x8x4xf32>
    "tpu.trace_stop"() : () -> ()
    %40 = vector.broadcast %38 : vector<2x8x1xf32> to vector<2x8x4xf32>
    %41 = arith.mulf %39, %40 : vector<2x8x4xf32>
    %42 = vector.extract_strided_slice %7 {offsets = [0, 0, 8], sizes = [2, 8, 4], strides = [1, 1, 1]} : vector<2x8x32xf32> to vector<2x8x4xf32>
    %43 = vector.extract_strided_slice %9 {offsets = [0, 0, 8], sizes = [2, 8, 4], strides = [1, 1, 1]} : vector<2x8x32xf32> to vector<2x8x4xf32>
    %44 = vector.extract_strided_slice %11 {offsets = [0, 0, 8], sizes = [2, 8, 4], strides = [1, 1, 1]} : vector<2x8x32xf32> to vector<2x8x4xf32>
    "tpu.trace_start"() <{level = 10 : i32, message = "nld,nmd->nlm"}> : () -> ()
    %cst_13 = arith.constant dense<0.000000e+00> : vector<2x8x8xf32>
    %45 = tpu.matmul %42, %43, %cst_13 {dimension_numbers = #tpu.dot_dimension_numbers<[2], [2], [1], [1], [0, 0, 0, 1, 1, 1], [0], [0]>} : vector<2x8x4xf32>, vector<2x8x4xf32>, vector<2x8x8xf32> -> vector<2x8x8xf32>
    "tpu.trace_stop"() : () -> ()
    %cst_14 = arith.constant dense<0xFF800000> : vector<2x8xf32>
    %46 = vector.multi_reduction <maximumf>, %45, %cst_14 [2] : vector<2x8x8xf32> to vector<2x8xf32>
    %47 = vector.shape_cast %46 : vector<2x8xf32> to vector<2x8x1xf32>
    %48 = vector.broadcast %47 : vector<2x8x1xf32> to vector<2x8x8xf32>
    %49 = arith.subf %45, %48 : vector<2x8x8xf32>
    %50 = math.exp %49 : vector<2x8x8xf32>
    %cst_15 = arith.constant dense<0.000000e+00> : vector<2x8xf32>
    %51 = vector.multi_reduction <add>, %50, %cst_15 [2] : vector<2x8x8xf32> to vector<2x8xf32>
    %52 = vector.shape_cast %51 : vector<2x8xf32> to vector<2x8x1xf32>
    %53 = tpu.reciprocal %52 {approx = true} : vector<2x8x1xf32> -> vector<2x8x1xf32>
    "tpu.trace_start"() <{level = 10 : i32, message = "nlm,nmd->nld"}> : () -> ()
    %cst_16 = arith.constant dense<0.000000e+00> : vector<2x8x4xf32>
    %54 = tpu.matmul %50, %44, %cst_16 {dimension_numbers = #tpu.dot_dimension_numbers<[2], [1], [1], [2], [0, 0, 0, 1, 1, 2], [0], [0]>} : vector<2x8x8xf32>, vector<2x8x4xf32>, vector<2x8x4xf32> -> vector<2x8x4xf32>
    "tpu.trace_stop"() : () -> ()
    %55 = vector.broadcast %53 : vector<2x8x1xf32> to vector<2x8x4xf32>
    %56 = arith.mulf %54, %55 : vector<2x8x4xf32>
    %57 = vector.extract_strided_slice %7 {offsets = [0, 0, 12], sizes = [2, 8, 4], strides = [1, 1, 1]} : vector<2x8x32xf32> to vector<2x8x4xf32>
    %58 = vector.extract_strided_slice %9 {offsets = [0, 0, 12], sizes = [2, 8, 4], strides = [1, 1, 1]} : vector<2x8x32xf32> to vector<2x8x4xf32>
    %59 = vector.extract_strided_slice %11 {offsets = [0, 0, 12], sizes = [2, 8, 4], strides = [1, 1, 1]} : vector<2x8x32xf32> to vector<2x8x4xf32>
    "tpu.trace_start"() <{level = 10 : i32, message = "nld,nmd->nlm"}> : () -> ()
    %cst_17 = arith.constant dense<0.000000e+00> : vector<2x8x8xf32>
    %60 = tpu.matmul %57, %58, %cst_17 {dimension_numbers = #tpu.dot_dimension_numbers<[2], [2], [1], [1], [0, 0, 0, 1, 1, 1], [0], [0]>} : vector<2x8x4xf32>, vector<2x8x4xf32>, vector<2x8x8xf32> -> vector<2x8x8xf32>
    "tpu.trace_stop"() : () -> ()
    %cst_18 = arith.constant dense<0xFF800000> : vector<2x8xf32>
    %61 = vector.multi_reduction <maximumf>, %60, %cst_18 [2] : vector<2x8x8xf32> to vector<2x8xf32>
    %62 = vector.shape_cast %61 : vector<2x8xf32> to vector<2x8x1xf32>
    %63 = vector.broadcast %62 : vector<2x8x1xf32> to vector<2x8x8xf32>
    %64 = arith.subf %60, %63 : vector<2x8x8xf32>
    %65 = math.exp %64 : vector<2x8x8xf32>
    %cst_19 = arith.constant dense<0.000000e+00> : vector<2x8xf32>
    %66 = vector.multi_reduction <add>, %65, %cst_19 [2] : vector<2x8x8xf32> to vector<2x8xf32>
    %67 = vector.shape_cast %66 : vector<2x8xf32> to vector<2x8x1xf32>
    %68 = tpu.reciprocal %67 {approx = true} : vector<2x8x1xf32> -> vector<2x8x1xf32>
    "tpu.trace_start"() <{level = 10 : i32, message = "nlm,nmd->nld"}> : () -> ()
    %cst_20 = arith.constant dense<0.000000e+00> : vector<2x8x4xf32>
    %69 = tpu.matmul %65, %59, %cst_20 {dimension_numbers = #tpu.dot_dimension_numbers<[2], [1], [1], [2], [0, 0, 0, 1, 1, 2], [0], [0]>} : vector<2x8x8xf32>, vector<2x8x4xf32>, vector<2x8x4xf32> -> vector<2x8x4xf32>
    "tpu.trace_stop"() : () -> ()
    %70 = vector.broadcast %68 : vector<2x8x1xf32> to vector<2x8x4xf32>
    %71 = arith.mulf %69, %70 : vector<2x8x4xf32>
    %72 = vector.extract_strided_slice %7 {offsets = [0, 0, 16], sizes = [2, 8, 4], strides = [1, 1, 1]} : vector<2x8x32xf32> to vector<2x8x4xf32>
    %73 = vector.extract_strided_slice %9 {offsets = [0, 0, 16], sizes = [2, 8, 4], strides = [1, 1, 1]} : vector<2x8x32xf32> to vector<2x8x4xf32>
    %74 = vector.extract_strided_slice %11 {offsets = [0, 0, 16], sizes = [2, 8, 4], strides = [1, 1, 1]} : vector<2x8x32xf32> to vector<2x8x4xf32>
    "tpu.trace_start"() <{level = 10 : i32, message = "nld,nmd->nlm"}> : () -> ()
    %cst_21 = arith.constant dense<0.000000e+00> : vector<2x8x8xf32>
    %75 = tpu.matmul %72, %73, %cst_21 {dimension_numbers = #tpu.dot_dimension_numbers<[2], [2], [1], [1], [0, 0, 0, 1, 1, 1], [0], [0]>} : vector<2x8x4xf32>, vector<2x8x4xf32>, vector<2x8x8xf32> -> vector<2x8x8xf32>
    "tpu.trace_stop"() : () -> ()
    %cst_22 = arith.constant dense<0xFF800000> : vector<2x8xf32>
    %76 = vector.multi_reduction <maximumf>, %75, %cst_22 [2] : vector<2x8x8xf32> to vector<2x8xf32>
    %77 = vector.shape_cast %76 : vector<2x8xf32> to vector<2x8x1xf32>
    %78 = vector.broadcast %77 : vector<2x8x1xf32> to vector<2x8x8xf32>
    %79 = arith.subf %75, %78 : vector<2x8x8xf32>
    %80 = math.exp %79 : vector<2x8x8xf32>
    %cst_23 = arith.constant dense<0.000000e+00> : vector<2x8xf32>
    %81 = vector.multi_reduction <add>, %80, %cst_23 [2] : vector<2x8x8xf32> to vector<2x8xf32>
    %82 = vector.shape_cast %81 : vector<2x8xf32> to vector<2x8x1xf32>
    %83 = tpu.reciprocal %82 {approx = true} : vector<2x8x1xf32> -> vector<2x8x1xf32>
    "tpu.trace_start"() <{level = 10 : i32, message = "nlm,nmd->nld"}> : () -> ()
    %cst_24 = arith.constant dense<0.000000e+00> : vector<2x8x4xf32>
    %84 = tpu.matmul %80, %74, %cst_24 {dimension_numbers = #tpu.dot_dimension_numbers<[2], [1], [1], [2], [0, 0, 0, 1, 1, 2], [0], [0]>} : vector<2x8x8xf32>, vector<2x8x4xf32>, vector<2x8x4xf32> -> vector<2x8x4xf32>
    "tpu.trace_stop"() : () -> ()
    %85 = vector.broadcast %83 : vector<2x8x1xf32> to vector<2x8x4xf32>
    %86 = arith.mulf %84, %85 : vector<2x8x4xf32>
    %87 = vector.extract_strided_slice %7 {offsets = [0, 0, 20], sizes = [2, 8, 4], strides = [1, 1, 1]} : vector<2x8x32xf32> to vector<2x8x4xf32>
    %88 = vector.extract_strided_slice %9 {offsets = [0, 0, 20], sizes = [2, 8, 4], strides = [1, 1, 1]} : vector<2x8x32xf32> to vector<2x8x4xf32>
    %89 = vector.extract_strided_slice %11 {offsets = [0, 0, 20], sizes = [2, 8, 4], strides = [1, 1, 1]} : vector<2x8x32xf32> to vector<2x8x4xf32>
    "tpu.trace_start"() <{level = 10 : i32, message = "nld,nmd->nlm"}> : () -> ()
    %cst_25 = arith.constant dense<0.000000e+00> : vector<2x8x8xf32>
    %90 = tpu.matmul %87, %88, %cst_25 {dimension_numbers = #tpu.dot_dimension_numbers<[2], [2], [1], [1], [0, 0, 0, 1, 1, 1], [0], [0]>} : vector<2x8x4xf32>, vector<2x8x4xf32>, vector<2x8x8xf32> -> vector<2x8x8xf32>
    "tpu.trace_stop"() : () -> ()
    %cst_26 = arith.constant dense<0xFF800000> : vector<2x8xf32>
    %91 = vector.multi_reduction <maximumf>, %90, %cst_26 [2] : vector<2x8x8xf32> to vector<2x8xf32>
    %92 = vector.shape_cast %91 : vector<2x8xf32> to vector<2x8x1xf32>
    %93 = vector.broadcast %92 : vector<2x8x1xf32> to vector<2x8x8xf32>
    %94 = arith.subf %90, %93 : vector<2x8x8xf32>
    %95 = math.exp %94 : vector<2x8x8xf32>
    %cst_27 = arith.constant dense<0.000000e+00> : vector<2x8xf32>
    %96 = vector.multi_reduction <add>, %95, %cst_27 [2] : vector<2x8x8xf32> to vector<2x8xf32>
    %97 = vector.shape_cast %96 : vector<2x8xf32> to vector<2x8x1xf32>
    %98 = tpu.reciprocal %97 {approx = true} : vector<2x8x1xf32> -> vector<2x8x1xf32>
    "tpu.trace_start"() <{level = 10 : i32, message = "nlm,nmd->nld"}> : () -> ()
    %cst_28 = arith.constant dense<0.000000e+00> : vector<2x8x4xf32>
    %99 = tpu.matmul %95, %89, %cst_28 {dimension_numbers = #tpu.dot_dimension_numbers<[2], [1], [1], [2], [0, 0, 0, 1, 1, 2], [0], [0]>} : vector<2x8x8xf32>, vector<2x8x4xf32>, vector<2x8x4xf32> -> vector<2x8x4xf32>
    "tpu.trace_stop"() : () -> ()
    %100 = vector.broadcast %98 : vector<2x8x1xf32> to vector<2x8x4xf32>
    %101 = arith.mulf %99, %100 : vector<2x8x4xf32>
    %102 = vector.extract_strided_slice %7 {offsets = [0, 0, 24], sizes = [2, 8, 4], strides = [1, 1, 1]} : vector<2x8x32xf32> to vector<2x8x4xf32>
    %103 = vector.extract_strided_slice %9 {offsets = [0, 0, 24], sizes = [2, 8, 4], strides = [1, 1, 1]} : vector<2x8x32xf32> to vector<2x8x4xf32>
    %104 = vector.extract_strided_slice %11 {offsets = [0, 0, 24], sizes = [2, 8, 4], strides = [1, 1, 1]} : vector<2x8x32xf32> to vector<2x8x4xf32>
    "tpu.trace_start"() <{level = 10 : i32, message = "nld,nmd->nlm"}> : () -> ()
    %cst_29 = arith.constant dense<0.000000e+00> : vector<2x8x8xf32>
    %105 = tpu.matmul %102, %103, %cst_29 {dimension_numbers = #tpu.dot_dimension_numbers<[2], [2], [1], [1], [0, 0, 0, 1, 1, 1], [0], [0]>} : vector<2x8x4xf32>, vector<2x8x4xf32>, vector<2x8x8xf32> -> vector<2x8x8xf32>
    "tpu.trace_stop"() : () -> ()
    %cst_30 = arith.constant dense<0xFF800000> : vector<2x8xf32>
    %106 = vector.multi_reduction <maximumf>, %105, %cst_30 [2] : vector<2x8x8xf32> to vector<2x8xf32>
    %107 = vector.shape_cast %106 : vector<2x8xf32> to vector<2x8x1xf32>
    %108 = vector.broadcast %107 : vector<2x8x1xf32> to vector<2x8x8xf32>
    %109 = arith.subf %105, %108 : vector<2x8x8xf32>
    %110 = math.exp %109 : vector<2x8x8xf32>
    %cst_31 = arith.constant dense<0.000000e+00> : vector<2x8xf32>
    %111 = vector.multi_reduction <add>, %110, %cst_31 [2] : vector<2x8x8xf32> to vector<2x8xf32>
    %112 = vector.shape_cast %111 : vector<2x8xf32> to vector<2x8x1xf32>
    %113 = tpu.reciprocal %112 {approx = true} : vector<2x8x1xf32> -> vector<2x8x1xf32>
    "tpu.trace_start"() <{level = 10 : i32, message = "nlm,nmd->nld"}> : () -> ()
    %cst_32 = arith.constant dense<0.000000e+00> : vector<2x8x4xf32>
    %114 = tpu.matmul %110, %104, %cst_32 {dimension_numbers = #tpu.dot_dimension_numbers<[2], [1], [1], [2], [0, 0, 0, 1, 1, 2], [0], [0]>} : vector<2x8x8xf32>, vector<2x8x4xf32>, vector<2x8x4xf32> -> vector<2x8x4xf32>
    "tpu.trace_stop"() : () -> ()
    %115 = vector.broadcast %113 : vector<2x8x1xf32> to vector<2x8x4xf32>
    %116 = arith.mulf %114, %115 : vector<2x8x4xf32>
    %117 = vector.extract_strided_slice %7 {offsets = [0, 0, 28], sizes = [2, 8, 4], strides = [1, 1, 1]} : vector<2x8x32xf32> to vector<2x8x4xf32>
    %118 = vector.extract_strided_slice %9 {offsets = [0, 0, 28], sizes = [2, 8, 4], strides = [1, 1, 1]} : vector<2x8x32xf32> to vector<2x8x4xf32>
    %119 = vector.extract_strided_slice %11 {offsets = [0, 0, 28], sizes = [2, 8, 4], strides = [1, 1, 1]} : vector<2x8x32xf32> to vector<2x8x4xf32>
    "tpu.trace_start"() <{level = 10 : i32, message = "nld,nmd->nlm"}> : () -> ()
    %cst_33 = arith.constant dense<0.000000e+00> : vector<2x8x8xf32>
    %120 = tpu.matmul %117, %118, %cst_33 {dimension_numbers = #tpu.dot_dimension_numbers<[2], [2], [1], [1], [0, 0, 0, 1, 1, 1], [0], [0]>} : vector<2x8x4xf32>, vector<2x8x4xf32>, vector<2x8x8xf32> -> vector<2x8x8xf32>
    "tpu.trace_stop"() : () -> ()
    %cst_34 = arith.constant dense<0xFF800000> : vector<2x8xf32>
    %121 = vector.multi_reduction <maximumf>, %120, %cst_34 [2] : vector<2x8x8xf32> to vector<2x8xf32>
    %122 = vector.shape_cast %121 : vector<2x8xf32> to vector<2x8x1xf32>
    %123 = vector.broadcast %122 : vector<2x8x1xf32> to vector<2x8x8xf32>
    %124 = arith.subf %120, %123 : vector<2x8x8xf32>
    %125 = math.exp %124 : vector<2x8x8xf32>
    %cst_35 = arith.constant dense<0.000000e+00> : vector<2x8xf32>
    %126 = vector.multi_reduction <add>, %125, %cst_35 [2] : vector<2x8x8xf32> to vector<2x8xf32>
    %127 = vector.shape_cast %126 : vector<2x8xf32> to vector<2x8x1xf32>
    %128 = tpu.reciprocal %127 {approx = true} : vector<2x8x1xf32> -> vector<2x8x1xf32>
    "tpu.trace_start"() <{level = 10 : i32, message = "nlm,nmd->nld"}> : () -> ()
    %cst_36 = arith.constant dense<0.000000e+00> : vector<2x8x4xf32>
    %129 = tpu.matmul %125, %119, %cst_36 {dimension_numbers = #tpu.dot_dimension_numbers<[2], [1], [1], [2], [0, 0, 0, 1, 1, 2], [0], [0]>} : vector<2x8x8xf32>, vector<2x8x4xf32>, vector<2x8x4xf32> -> vector<2x8x4xf32>
    "tpu.trace_stop"() : () -> ()
    %130 = vector.broadcast %128 : vector<2x8x1xf32> to vector<2x8x4xf32>
    %131 = arith.mulf %129, %130 : vector<2x8x4xf32>
    %132 = tpu.concatenate %26, %41, %56, %71, %86, %101, %116, %131 in 2 : vector<2x8x4xf32>, vector<2x8x4xf32>, vector<2x8x4xf32>, vector<2x8x4xf32>, vector<2x8x4xf32>, vector<2x8x4xf32>, vector<2x8x4xf32>, vector<2x8x4xf32> -> vector<2x8x32xf32>
    %133 = vector.shape_cast %132 : vector<2x8x32xf32> to vector<16x32xf32>
    %c0_37 = arith.constant 0 : index
    %c0_38 = arith.constant 0 : index
    %134 = vector.load %arg3[%c0_37, %c0_38] : memref<32x16xf32, #tpu.memory_space<vmem>>, vector<32x16xf32>
    %cst_39 = arith.constant dense<0.000000e+00> : vector<16x16xf32>
    %135 = tpu.matmul %133, %134, %cst_39 {dimension_numbers = #tpu.dot_dimension_numbers<[1], [0], [0], [1], [0, 0, 1, 1], [], []>} : vector<16x32xf32>, vector<32x16xf32>, vector<16x16xf32> -> vector<16x16xf32>
    %c0_40 = arith.constant 0 : index
    %c0_41 = arith.constant 0 : index
    %136 = vector.load %arg4[%c0_40, %c0_41] : memref<1x16xf32, #tpu.memory_space<vmem>>, vector<1x16xf32>
    %137 = vector.broadcast %136 : vector<1x16xf32> to vector<16x16xf32>
    %138 = arith.addf %135, %137 : vector<16x16xf32>
    %c0_42 = arith.constant 0 : index
    %c0_43 = arith.constant 0 : index
    %139 = vector.load %arg5[%c0_42, %c0_43] : memref<16x16xf32, #tpu.memory_space<vmem>>, vector<16x16xf32>
    tpu.vector_store %arg5[%c0_42, %c0_43], %138 {strides = array<i32>} : memref<16x16xf32, #tpu.memory_space<vmem>>, vector<16x16xf32>,
    return
  }
}

</mosaic_0001>

<bundles_post_ra>
// kernel: attention_block_pallas.1
= control target key start
LH: loop header
LB: loop body
LE: loop exit
PB: predicated region body
PF: predicated region fallthrough
CT: control target
= control target key end

     0   :  { %vm30_vm0 = vcmask 261120   ;;  %s1397_s7 = smov 96   ;;  %s1400_s8 = smov 84   ;;  %vm63_vm1 = vcmask 31744   ;;  %vm115_vm2 = vcmask 64512   ;;  %vm1163_vm3 = vcmask 130048   ;;  %s1712_s1 = inlined_call_operand.vmem [shape: f32[32,96], index: 1, kind: input, shape index: {}]   ;;  %s1713_s2 = inlined_call_operand.vmem [shape: f32[1,96], index: 2, kind: input, shape index: {}]   ;;  %s1714_s0 = inlined_call_operand.vmem [shape: f32[16,32], index: 0, kind: input, shape index: {}]   ;;  %s1715_s4 = inlined_call_operand.vmem [shape: f32[1,16], index: 4, kind: input, shape index: {}]   ;;  %s1716_s3 = inlined_call_operand.vmem [shape: f32[32,16], index: 3, kind: input, shape index: {}]   ;;  %s1717_s5 = inlined_call_operand.vmem [shape: f32[16,16], index: 5, kind: output, shape index: {}]  }
   0x1   :  { %v25_v0 = vld [vmem:[%s1712_s1 + $0x18] sm:$0xff]  ;;  %v24_v1 = vld [vmem:[%s1712_s1 + $0x10] sm:$0xff]  ;;  %v23_v2 = vld [vmem:[%s1712_s1 + $0x8] sm:$0xff]  ;;  %s1401_s9 = smov 120   ;;  %s1402_s10 = smov 112   ;;  %vm1160_vm4 = vcmask 97280  }
   0x2   :  { %49 = vmatpush.msra.mxu0 %v25_v0  ;;  %v22_v3 = vld [vmem:[%s1712_s1] sm:$0xff]  ;;  %v21_v5 = vld [vmem:[%s1714_s0 + $0x8] sm:$0xff]  ;;  %s1396_s1 = smov 92   ;;  %s1403_s11 = smov 116   ;;  %vm1166_vm5 = vcmask 162816   ;;  %vm1169_vm6 = vcmask 195584  }
   0x3   :  { %v20_v4 = vld [vmem:[%s1714_s0] sm:$0xff]  ;;  %s1398_s0 = smov 88   ;;  %s1404_s12 = smov 80   ;;  %vm1172_vm7 = vcmask 228352  }
   0x4   :  { %50 = vmatpush.msra.mxu0 %v24_v1  ;;  %v1330_v6 = vld [vmem:[%s1713_s2] ss:$0 sm:$0xff]  ;;  %s1399_s2 = smov 124   ;;  %s1405_s13 = smov 76  }
   0x5   :  { %s1406_s14 = smov 108   ;;  %s1407_s15 = smov 72  }
   0x6   :  { %51 = vmatpush.msra.mxu0 %v23_v2  ;;  %s1408_s16 = smov 104   ;;  %s1409_s17 = smov 100  }
   0x7   :  { %s1410_s18 = smov 68   ;;  %s1411_s19 = smov 64  }
   0x8   :  { %52 = vmatpush.msra.mxu0 %v22_v3  ;;  %s1412_s20 = smov 44   ;;  %s1413_s21 = smov 60  }
   0x9   :  { %1218 = vmatmul.msk.f32.vlgmr.msra.gmra.mxu0 %vm30_vm0, %v20_v4  ;;  %s1414_s22 = smov 56   ;;  %s1415_s23 = smov 52  }
   0xa   :  { %s1416_s24 = smov 48   ;;  %s1417_s25 = smov 40  }
   0xb   :  { %s1418_s26 = smov 36   ;;  %s1419_s27 = smov 4  }
   0xc   :  { %s1420_s28 = smov 8   ;;  %s1421_s29 = smov 12  }
   0xd   :  { %s1422_s30 = smov 16   ;;  %s1423_s6 = smov 20  }
  0x11   :  { %1219 = vmatmul.msk.f32.gmra.mxu0 %vm30_vm0, %v21_v5 }
  0x86   :  { %v54_v7 = vpop.f32.mrf.mxu0 }
  0x87   :  { %v1479_v8 = vadd.f32 %v1330_v6, %v54_v7 }
  0x89   :  { %192 = vrot.lane.b32.xlu2 %v1479_v8, %s1396_s1  ;;  %61 = vrot.lane.b32.xlu0 %v1479_v8, %s1397_s7 }
  0x8e   :  { %v57_v9 = vpop.f32.mrf.mxu0 }
  0x8f   :  { %v1483_v10 = vadd.f32 %v1330_v6, %v57_v9 }
  0x91   :  { %220 = vrot.lane.b32.xlu1 %v1483_v10, %s1396_s1  ;;  %322 = vrot.lane.b32.xlu2 %v1479_v8, %s1398_s0  ;;  %v1300_v11 = vpack.i.bf16 %v1483_v10, %v1479_v8  ;;  %s1424_s1 = smov 24  }
  0x92   :  { %89 = vrot.lane.b32.xlu0 %v1483_v10, %s1397_s7  ;;  %s1425_s7 = smov 28  }
  0x99   :  { %218 = vrot.lane.b32.xlu1 %v1483_v10, %s1399_s2  ;;  %452 = vrot.lane.b32.xlu2 %v1479_v8, %s1400_s8 }
  0x9a   :  { %190 = vrot.lane.b32.xlu0 %v1479_v8, %s1399_s2 }
  0xa1   :  { %320 = vrot.lane.b32.xlu1 %v1479_v8, %s1401_s9  ;;  %580 = vrot.lane.b32.xlu2 %v1479_v8, %s1402_s10 }
  0xa2   :  { %450 = vrot.lane.b32.xlu0 %v1479_v8, %s1403_s11 }
  0xa9   :  { %582 = vrot.lane.b32.xlu1 %v1479_v8, %s1404_s12  ;;  %712 = vrot.lane.b32.xlu2 %v1479_v8, %s1405_s13 }
  0xaa   :  { %710 = vrot.lane.b32.xlu0 %v1479_v8, %s1406_s14 }
  0xb1   :  { %348 = vrot.lane.b32.xlu1 %v1483_v10, %s1401_s9  ;;  %478 = vrot.lane.b32.xlu2 %v1483_v10, %s1403_s11 }
  0xb2   :  { %350 = vrot.lane.b32.xlu0 %v1483_v10, %s1398_s0 }
  0xb9   :  { %480 = vrot.lane.b32.xlu1 %v1483_v10, %s1400_s8  ;;  %610 = vrot.lane.b32.xlu2 %v1483_v10, %s1404_s12 }
  0xba   :  { %842 = vrot.lane.b32.xlu0 %v1479_v8, %s1407_s15 }
  0xc1   :  { %840 = vrot.lane.b32.xlu1 %v1479_v8, %s1408_s16  ;;  %970 = vrot.lane.b32.xlu2 %v1479_v8, %s1409_s17 }
  0xc2   :  { %608 = vrot.lane.b32.xlu0 %v1483_v10, %s1402_s10 }
  0xc9   :  { %972 = vrot.lane.b32.xlu1 %v1479_v8, %s1410_s18  ;;  %870 = vrot.lane.b32.xlu2 %v1483_v10, %s1407_s15 }
  0xca   :  { %740 = vrot.lane.b32.xlu0 %v1483_v10, %s1405_s13 }
  0xd1   :  { %738 = vrot.lane.b32.xlu1 %v1483_v10, %s1406_s14  ;;  %998 = vrot.lane.b32.xlu2 %v1483_v10, %s1409_s17 }
  0xd2   :  { %868 = vrot.lane.b32.xlu0 %v1483_v10, %s1408_s16 }
  0xd9   :  { %1000 = vrot.lane.b32.xlu1 %v1483_v10, %s1410_s18  ;;  %1301 = vrot.lane.b32.xlu2 %v1300_v11, %s1411_s19 }
  0xda   :  { %1326 = vrot.lane.b32.xlu0 %v1300_v11, %s1412_s20 }
  0xe1   :  { %1306 = vrot.lane.b32.xlu1 %v1300_v11, %s1413_s21  ;;  %1311 = vrot.lane.b32.xlu2 %v1300_v11, %s1414_s22 }
  0xe3   :  { %v193_v12 = vpop.permute.xlu2 %192 }
  0xe9   :  { %1316 = vrot.lane.b32.xlu1 %v1300_v11, %s1415_s23  ;;  %1321 = vrot.lane.b32.xlu2 %v1300_v11, %s1416_s24 }
  0xeb   :  { %v323_v13 = vpop.permute.xlu2 %322 }
  0xf3   :  { %v453_v14 = vpop.permute.xlu2 %452 }
  0xfb   :  { %v581_v15 = vpop.permute.xlu2 %580  ;;  %v62_v16 = vpop.permute.xlu0 %61 }
  0xfc   :  { %1220 = vmatpush.xpose.msk.msra.mxu1 %vm63_vm1, %v62_v16 }
  0xff   :  { %1221 = vmatmul.msk.f32.vlgmr.msra.gmra.mxu1 %vm63_vm1, %v1479_v8 }
 0x100   :  { %1226 = vmatpush.xpose.msk.msrb.mxu1 %vm63_vm1, %v193_v12 }
 0x103   :  { %v221_v17 = vpop.permute.xlu1 %220  ;;  %v713_v18 = vpop.permute.xlu2 %712 }
 0x104   :  { %v90_v19 = vpop.permute.xlu0 %89  ;;  %1228 = vmatpush.xpose.msk.msra.mxu2 %vm63_vm1, %v221_v17 }
 0x105   :  { %1222 = vmatpush.xpose.msk.msrb.mxu0 %vm63_vm1, %v90_v19 }
 0x108   :  { %1232 = vmatpush.xpose.msk.msrb.mxu2 %vm63_vm1, %v323_v13  ;;  %1223 = vmatmul.msk.f32.vlgmr.msrb.gmra.mxu0 %vm63_vm1, %v1483_v10 }
 0x10b   :  { %v219_v20 = vpop.permute.xlu1 %218  ;;  %v479_v21 = vpop.permute.xlu2 %478 }
 0x10c   :  { %v191_v22 = vpop.permute.xlu0 %190  ;;  %1229 = vmatmul.msk.f32.vlgmr.msra.gmra.mxu2 %vm63_vm1, %v219_v20 }
 0x10d   :  { %1227 = vmatmul.msk.f32.vlgmr.msrb.gmra.mxu1 %vm63_vm1, %v191_v22  ;;  %1238 = vmatpush.xpose.msk.msra.mxu2 %vm63_vm1, %v453_v14 }
 0x113   :  { %v321_v23 = vpop.permute.xlu1 %320  ;;  %v611_v24 = vpop.permute.xlu2 %610 }
 0x114   :  { %v451_v25 = vpop.permute.xlu0 %450  ;;  %1233 = vmatmul.msk.f32.vlgmr.msrb.gmra.mxu2 %vm63_vm1, %v321_v23 }
 0x11b   :  { %v583_v26 = vpop.permute.xlu1 %582  ;;  %v971_v27 = vpop.permute.xlu2 %970 }
 0x11c   :  { %v711_v28 = vpop.permute.xlu0 %710  ;;  %1239 = vmatmul.msk.f32.vlgmr.msra.gmra.mxu2 %vm63_vm1, %v451_v25 }
 0x11d   :  { %1244 = vmatpush.xpose.msk.msrb.mxu2 %vm63_vm1, %v583_v26 }
 0x121   :  { %1250 = vmatpush.xpose.msk.msra.mxu2 %vm63_vm1, %v713_v18 }
 0x123   :  { %v349_v29 = vpop.permute.xlu1 %348  ;;  %v871_v30 = vpop.permute.xlu2 %870 }
 0x124   :  { %v351_v31 = vpop.permute.xlu0 %350  ;;  %1245 = vmatmul.msk.f32.vlgmr.msrb.gmra.mxu2 %vm63_vm1, %v581_v15 }
 0x125   :  { %1234 = vmatpush.xpose.msk.msra.mxu0 %vm63_vm1, %v351_v31 }
 0x128   :  { %1235 = vmatmul.msk.f32.vlgmr.msra.gmra.mxu0 %vm63_vm1, %v349_v29 }
 0x12b   :  { %v481_v32 = vpop.permute.xlu1 %480  ;;  %v999_v33 = vpop.permute.xlu2 %998 }
 0x12c   :  { %v843_v34 = vpop.permute.xlu0 %842  ;;  %1240 = vmatpush.xpose.msk.msrb.mxu0 %vm63_vm1, %v481_v32  ;;  %1251 = vmatmul.msk.f32.vlgmr.msra.gmra.mxu2 %vm63_vm1, %v711_v28 }
 0x12d   :  { %1256 = vmatpush.xpose.msk.msrb.mxu2 %vm63_vm1, %v843_v34 }
 0x130   :  { %1246 = vmatpush.xpose.msk.msra.mxu0 %vm63_vm1, %v611_v24 }
 0x131   :  { %1241 = vmatmul.msk.f32.vlgmr.msrb.gmra.mxu0 %vm63_vm1, %v479_v21 }
 0x133   :  { %v841_v35 = vpop.permute.xlu1 %840  ;;  %v1302_v36 = vpop.permute.xlu2 %1301 }
 0x134   :  { %v609_v37 = vpop.permute.xlu0 %608  ;;  %1257 = vmatmul.msk.f32.vlgmr.msrb.gmra.mxu2 %vm63_vm1, %v841_v35  ;;  %v1303_v38 = vunpack.i.l.bf16 %v1302_v36  ;;  %v1304_v39 = vunpack.i.h.bf16 %v1302_v36 }
 0x136   :  { %157 = vmatpush.msra.mxu3 %v1303_v38 }
 0x138   :  { %183 = vmatpush.msrb.mxu3 %v1304_v39 }
 0x139   :  { %1247 = vmatmul.msk.f32.vlgmr.msra.gmra.mxu0 %vm63_vm1, %v609_v37 }
 0x13b   :  { %v973_v40 = vpop.permute.xlu1 %972  ;;  %v1548_v45 = vpop.permute.xlu2 %1311 }
 0x13c   :  { %v741_v41 = vpop.permute.xlu0 %740  ;;  %1262 = vmatpush.xpose.msk.msra.mxu2 %vm63_vm1, %v973_v40  ;;  %v1314_v48 = vunpack.i.h.bf16 %v1548_v45  ;;  %v1313_v31 = vunpack.i.l.bf16 %v1548_v45 }
 0x13d   :  { %1252 = vmatpush.xpose.msk.msrb.mxu0 %vm63_vm1, %v741_v41 }
 0x13f   :  { %1263 = vmatmul.msk.f32.vlgmr.msra.gmra.mxu2 %vm63_vm1, %v971_v27 }
 0x141   :  { %1258 = vmatpush.xpose.msk.msra.mxu0 %vm63_vm1, %v871_v30 }
 0x143   :  { %v739_v42 = vpop.permute.xlu1 %738  ;;  %v1322_v22 = vpop.permute.xlu2 %1321 }
 0x144   :  { %1253 = vmatmul.msk.f32.vlgmr.msrb.gmra.mxu0 %vm63_vm1, %v739_v42  ;;  %v869_v43 = vpop.permute.xlu0 %868 }
 0x14b   :  { %v1001_v44 = vpop.permute.xlu1 %1000 }
 0x14c   :  { %1259 = vmatmul.msk.f32.vlgmr.msra.gmra.mxu0 %vm63_vm1, %v869_v43  ;;  %v1611_v17 = vpop.permute.xlu0 %1326 }
 0x14d   :  { %1264 = vmatpush.xpose.msk.msrb.mxu0 %vm63_vm1, %v1001_v44 }
 0x153   :  { %v1550_v46 = vpop.permute.xlu1 %1306 }
 0x154   :  { %v1309_v47 = vunpack.i.h.bf16 %v1550_v46  ;;  %1265 = vmatmul.msk.f32.vlgmr.msrb.gmra.mxu0 %vm63_vm1, %v999_v33  ;;  %v1308_v26 = vunpack.i.l.bf16 %v1550_v46 }
 0x156   :  { %313 = vmatpush.msra.mxu1 %v1309_v47 }
 0x158   :  { %443 = vmatpush.msrb.mxu1 %v1314_v48 }
 0x15b   :  { %v1317_v19 = vpop.permute.xlu1 %1316 }
 0x15c   :  { %v1318_v37 = vunpack.i.l.bf16 %v1317_v19  ;;  %v1319_v39 = vunpack.i.h.bf16 %v1317_v19 }
 0x17c   :  { %v85_v49 = vpop.f32.mrf.mxu1 }
 0x17d   :  { %v116_v50 = vsel %vm115_vm2, %v85_v49, -inf }
 0x17e   :  { %117 = vmax.xlane.f32.xlu0 %v116_v50  ;;  %v1324_v50 = vunpack.i.h.bf16 %v1322_v22 }
 0x185   :  { %v112_v51 = vpop.f32.mrf.mxu0 }
 0x186   :  { %v119_v52 = vsel %vm115_vm2, %v112_v51, -inf }
 0x187   :  { %120 = vmax.xlane.f32.xlu1 %v119_v52 }
 0x18a   :  { %v1557_v53 = vpop.f32.mrf.mxu1 }
 0x18b   :  { %v246_v54 = vsel %vm115_vm2, %v1557_v53, -inf }
 0x18c   :  { %247 = vmax.xlane.f32.xlu2 %v246_v54 }
 0x18f   :  { %v1561_v55 = vpop.f32.mrf.mxu2 }
 0x190   :  { %v249_v56 = vsel %vm115_vm2, %v1561_v55, -inf }
 0x194   :  { %250 = vmax.xlane.f32.xlu2 %v249_v56  ;;  %v1323_v56 = vunpack.i.l.bf16 %v1322_v22 }
 0x197   :  { %v1565_v57 = vpop.f32.mrf.mxu2 }
 0x198   :  { %v376_v62 = vsel %vm115_vm2, %v1565_v57, -inf }
 0x19f   :  { %v1567_v58 = vpop.f32.mrf.mxu2 }
 0x1a0   :  { %v506_v6 = vsel %vm115_vm2, %v1567_v58, -inf }
 0x1a5   :  { %v1569_v59 = vpop.f32.mrf.mxu0 }
 0x1a6   :  { %v379_v60 = vsel %vm115_vm2, %v1569_v59, -inf }
 0x1a7   :  { %380 = vmax.xlane.f32.xlu0 %v379_v60  ;;  %v1573_v61 = vpop.f32.mrf.mxu2 }
 0x1a8   :  { %v636_v15 = vsel %vm115_vm2, %v1573_v61, -inf }
 0x1ae   :  { %v1577_v63 = vpop.f32.mrf.mxu0 }
 0x1af   :  { %377 = vmax.xlane.f32.xlu0 %v376_v62  ;;  %v1579_v0 = vpop.f32.mrf.mxu2  ;;  %v509_v2 = vsel %vm115_vm2, %v1577_v63, -inf }
 0x1b0   :  { %v766_v1 = vsel %vm115_vm2, %v1579_v0, -inf }
 0x1b1   :  { %767 = vmax.xlane.f32.xlu1 %v766_v1 }
 0x1b6   :  { %v1589_v5 = vpop.f32.mrf.mxu0 }
 0x1b7   :  { %510 = vmax.xlane.f32.xlu0 %v509_v2  ;;  %v1585_v3 = vpop.f32.mrf.mxu2  ;;  %v639_v12 = vsel %vm115_vm2, %v1589_v5, -inf  ;;  %v1329_v2 = vunpack.i.h.bf16 %v1611_v17 }
 0x1b8   :  { %v896_v4 = vsel %vm115_vm2, %v1585_v3, -inf }
 0x1b9   :  { %897 = vmax.xlane.f32.xlu2 %v896_v4 }
 0x1bf   :  { %507 = vmax.xlane.f32.xlu0 %v506_v6 }
 0x1c1   :  { %v1593_v7 = vpop.f32.mrf.mxu0 }
 0x1c2   :  { %v1595_v9 = vpop.f32.mrf.mxu2  ;;  %v769_v16 = vsel %vm115_vm2, %v1593_v7, -inf }
 0x1c3   :  { %v1026_v11 = vsel %vm115_vm2, %v1595_v9, -inf }
 0x1c4   :  { %1027 = vmax.xlane.f32.xlu1 %v1026_v11 }
 0x1c7   :  { %640 = vmax.xlane.f32.xlu0 %v639_v12 }
 0x1c9   :  { %v1601_v13 = vpop.f32.mrf.mxu0 }
 0x1ca   :  { %v899_v14 = vsel %vm115_vm2, %v1601_v13, -inf }
 0x1cb   :  { %900 = vmax.xlane.f32.xlu2 %v899_v14 }
 0x1cf   :  { %637 = vmax.xlane.f32.xlu0 %v636_v15 }
 0x1d7   :  { %770 = vmax.xlane.f32.xlu0 %v769_v16  ;;  %v1328_v16 = vunpack.i.l.bf16 %v1611_v17 }
 0x1dd   :  { %916 = vrot.lane.b32.xlu1 %v1479_v8, %s1417_s25 }
 0x1e3   :  { %1046 = vrot.lane.b32.xlu2 %v1479_v8, %s1418_s26 }
 0x1eb   :  { %942 = vrot.lane.b32.xlu0 %v1483_v10, %s1417_s25  ;;  %1072 = vrot.lane.b32.xlu2 %v1483_v10, %s1418_s26  ;;  %v1618_v10 = vpop.f32.mrf.mxu0 }
 0x1ec   :  { %v1029_v32 = vsel %vm115_vm2, %v1618_v10, -inf }
 0x1f1   :  { %v118_v18 = vpop.xlane.xlu0 %117 }
 0x1f2   :  { %v122_v20 = vsub.f32 %v85_v49, %v118_v18 }
 0x1f4   :  { %v124_v21 = vmul.f32 1.442695, %v122_v20 }
 0x1f6   :  { %1332 = vpow2.f32 %v124_v21 }
 0x1fa   :  { %v121_v23 = vpop.xlane.xlu1 %120 }
 0x1fb   :  { %v123_v24 = vsub.f32 %v112_v51, %v121_v23 }
 0x1fc   :  { %v1333_v25 = vpop.eup %1332 }
 0x1fd   :  { %v126_v27 = vmul.f32 1.442695, %v123_v24  ;;  %1224 = vmatmul.msk.f32.vlgmr.msra.gmra.mxu3 %vm115_vm2, %v1333_v25  ;;  %v128_v42 = vsel %vm115_vm2, %v1333_v25, 0.0 }
 0x1fe   :  { %287 = vmatpush.msra.mxu3 %v1308_v26 }
 0x1ff   :  { %1334 = vpow2.f32 %v126_v27  ;;  %v248_v8 = vpop.xlane.xlu2 %247 }
 0x200   :  { %v252_v28 = vsub.f32 %v1557_v53, %v248_v8 }
 0x202   :  { %v254_v29 = vmul.f32 1.442695, %v252_v28 }
 0x204   :  { %1336 = vpow2.f32 %v254_v29 }
 0x205   :  { %v1335_v30 = vpop.eup %1334 }
 0x206   :  { %1225 = vmatmul.msk.f32.vlgmr.msrb.gmra.mxu3 %vm115_vm2, %v1335_v30  ;;  %v131_v41 = vsel %vm115_vm2, %v1335_v30, 0.0 }
 0x207   :  { %417 = vmatpush.msrb.mxu3 %v1313_v31  ;;  %v251_v33 = vpop.xlane.xlu2 %250  ;;  %1030 = vmax.xlane.f32.xlu1 %v1029_v32 }
 0x208   :  { %v253_v34 = vsub.f32 %v1561_v55, %v251_v33 }
 0x20a   :  { %v256_v35 = vmul.f32 1.442695, %v253_v34  ;;  %v1337_v36 = vpop.eup %1336 }
 0x20b   :  { %v258_v45 = vsel %vm115_vm2, %v1337_v36, 0.0 }
 0x20c   :  { %1338 = vpow2.f32 %v256_v35 }
 0x20e   :  { %1230 = vmatmul.msk.f32.vlgmr.msra.gmra.mxu3 %vm115_vm2, %v1337_v36 }
 0x20f   :  { %547 = vmatpush.msra.mxu3 %v1318_v37 }
 0x212   :  { %v1339_v38 = vpop.eup %1338 }
 0x213   :  { %1231 = vmatmul.msk.f32.vlgmr.msra.gmra.mxu1 %vm115_vm2, %v1339_v38  ;;  %v261_v40 = vsel %vm115_vm2, %v1339_v38, 0.0 }
 0x214   :  { %573 = vmatpush.msra.mxu1 %v1319_v39  ;;  %262 = vadd.xlane.f32.xlu1 %v261_v40 }
 0x215   :  { %132 = vadd.xlane.f32.xlu0 %v131_v41  ;;  %129 = vadd.xlane.f32.xlu2 %v128_v42 }
 0x21a   :  { %v381_v43 = vpop.xlane.xlu0 %380 }
 0x21b   :  { %v383_v44 = vsub.f32 %v1569_v59, %v381_v43 }
 0x21d   :  { %v386_v46 = vmul.f32 1.442695, %v383_v44  ;;  %259 = vadd.xlane.f32.xlu2 %v258_v45 }
 0x21f   :  { %1340 = vpow2.f32 %v386_v46 }
 0x222   :  { %v378_v47 = vpop.xlane.xlu0 %377 }
 0x223   :  { %v382_v48 = vsub.f32 %v1565_v57, %v378_v47 }
 0x224   :  { %v768_v6 = vpop.xlane.xlu1 %767 }
 0x225   :  { %v1341_v49 = vpop.eup %1340  ;;  %v384_v51 = vmul.f32 1.442695, %v382_v48  ;;  %v772_v25 = vsub.f32 %v1579_v0, %v768_v6 }
 0x226   :  { %1237 = vmatmul.msk.f32.vlgmr.msrb.gmra.mxu1 %vm115_vm2, %v1341_v49  ;;  %v391_v52 = vsel %vm115_vm2, %v1341_v49, 0.0 }
 0x227   :  { %1342 = vpow2.f32 %v384_v51  ;;  %703 = vmatpush.msrb.mxu1 %v1324_v50  ;;  %392 = vadd.xlane.f32.xlu2 %v391_v52  ;;  %v774_v28 = vmul.f32 1.442695, %v772_v25 }
 0x22a   :  { %v511_v53 = vpop.xlane.xlu0 %510 }
 0x22b   :  { %v513_v54 = vsub.f32 %v1577_v63, %v511_v53 }
 0x22c   :  { %v898_v11 = vpop.xlane.xlu2 %897 }
 0x22d   :  { %v1343_v55 = vpop.eup %1342  ;;  %v516_v59 = vmul.f32 1.442695, %v513_v54  ;;  %v902_v31 = vsub.f32 %v1585_v3, %v898_v11 }
 0x22e   :  { %1236 = vmatmul.msk.f32.vlgmr.msrb.gmra.mxu3 %vm115_vm2, %v1343_v55  ;;  %v388_v57 = vsel %vm115_vm2, %v1343_v55, 0.0 }
 0x22f   :  { %1344 = vpow2.f32 %v516_v59  ;;  %677 = vmatpush.msrb.mxu3 %v1323_v56  ;;  %389 = vadd.xlane.f32.xlu0 %v388_v57  ;;  %v904_v35 = vmul.f32 1.442695, %v902_v31 }
 0x232   :  { %v508_v60 = vpop.xlane.xlu0 %507 }
 0x233   :  { %v512_v62 = vsub.f32 %v1567_v58, %v508_v60 }
 0x235   :  { %v1345_v1 = vpop.eup %1344  ;;  %v514_v4 = vmul.f32 1.442695, %v512_v62 }
 0x236   :  { %1243 = vmatmul.msk.f32.vlgmr.msra.gmra.mxu1 %vm115_vm2, %v1345_v1  ;;  %v521_v63 = vsel %vm115_vm2, %v1345_v1, 0.0 }
 0x237   :  { %1346 = vpow2.f32 %v514_v4  ;;  %833 = vmatpush.msra.mxu1 %v1329_v2  ;;  %522 = vadd.xlane.f32.xlu0 %v521_v63  ;;  %v1028_v18 = vpop.xlane.xlu1 %1027 }
 0x238   :  { %v1032_v22 = vsub.f32 %v1595_v9, %v1028_v18 }
 0x23a   :  { %v641_v12 = vpop.xlane.xlu0 %640  ;;  %v1034_v26 = vmul.f32 1.442695, %v1032_v22 }
 0x23b   :  { %v643_v14 = vsub.f32 %v1589_v5, %v641_v12 }
 0x23d   :  { %v1347_v15 = vpop.eup %1346  ;;  %v646_v58 = vmul.f32 1.442695, %v643_v14 }
 0x23e   :  { %1242 = vmatmul.msk.f32.vlgmr.msra.gmra.mxu3 %vm115_vm2, %v1347_v15  ;;  %v901_v19 = vpop.xlane.xlu2 %900  ;;  %v518_v20 = vsel %vm115_vm2, %v1347_v15, 0.0 }
 0x23f   :  { %1348 = vpow2.f32 %v646_v58  ;;  %807 = vmatpush.msra.mxu3 %v1328_v16  ;;  %v903_v21 = vsub.f32 %v1601_v13, %v901_v19  ;;  %519 = vadd.xlane.f32.xlu1 %v518_v20 }
 0x241   :  { %v906_v23 = vmul.f32 1.442695, %v903_v21 }
 0x242   :  { %v638_v24 = vpop.xlane.xlu0 %637 }
 0x243   :  { %1350 = vpow2.f32 %v906_v23  ;;  %v642_v5 = vsub.f32 %v1573_v61, %v638_v24 }
 0x245   :  { %v1349_v17 = vpop.eup %1348  ;;  %v644_v27 = vmul.f32 1.442695, %v642_v5 }
 0x246   :  { %1249 = vmatmul.msk.f32.vlgmr.msrb.gmra.mxu1 %vm115_vm2, %v1349_v17  ;;  %v651_v8 = vsel %vm115_vm2, %v1349_v17, 0.0  ;;  %v1047_v38 = vpop.permute.xlu2 %1046 }
 0x247   :  { %1352 = vpow2.f32 %v644_v27  ;;  %652 = vadd.xlane.f32.xlu1 %v651_v8 }
 0x248   :  { %1354 = vpow2.f32 %v1034_v26 }
 0x249   :  { %v1351_v13 = vpop.eup %1350  ;;  %1356 = vpow2.f32 %v774_v28 }
 0x24a   :  { %v771_v9 = vpop.xlane.xlu0 %770  ;;  %v911_v29 = vsel %vm115_vm2, %v1351_v13, 0.0 }
 0x24b   :  { %v773_v30 = vsub.f32 %v1593_v7, %v771_v9  ;;  %912 = vadd.xlane.f32.xlu0 %v911_v29 }
 0x24d   :  { %v1353_v61 = vpop.eup %1352  ;;  %v776_v0 = vmul.f32 1.442695, %v773_v30 }
 0x24e   :  { %1248 = vmatmul.msk.f32.vlgmr.msrb.gmra.mxu3 %vm115_vm2, %v1353_v61  ;;  %v648_v32 = vsel %vm115_vm2, %v1353_v61, 0.0  ;;  %v1355_v33 = vpop.eup %1354  ;;  %v1073_v42 = vpop.permute.xlu2 %1072 }
 0x24f   :  { %1358 = vpow2.f32 %v776_v0  ;;  %649 = vadd.xlane.f32.xlu1 %v648_v32  ;;  %v917_v34 = vpop.permute.xlu1 %916  ;;  %v1038_v36 = vsel %vm115_vm2, %v1355_v33, 0.0  ;;  %v1357_v37 = vpop.eup %1356 }
 0x250   :  { %937 = vmatpush.msrb.mxu3 %v917_v34  ;;  %1360 = vpow2.f32 %v904_v35  ;;  %v778_v3 = vsel %vm115_vm2, %v1357_v37, 0.0 }
 0x253   :  { %1039 = vadd.xlane.f32.xlu0 %v1038_v36 }
 0x255   :  { %v1359_v7 = vpop.eup %1358 }
 0x256   :  { %1254 = vmatmul.msk.f32.vlgmr.msra.gmra.mxu3 %vm115_vm2, %v1357_v37  ;;  %1255 = vmatmul.msk.f32.vlgmr.msra.gmra.mxu1 %vm115_vm2, %v1359_v7  ;;  %v781_v39 = vsel %vm115_vm2, %v1359_v7, 0.0  ;;  %v1361_v40 = vpop.eup %1360 }
 0x257   :  { %1067 = vmatpush.msra.mxu3 %v1047_v38  ;;  %779 = vadd.xlane.f32.xlu1 %v778_v3  ;;  %v908_v43 = vsel %vm115_vm2, %v1361_v40, 0.0 }
 0x258   :  { %782 = vadd.xlane.f32.xlu2 %v781_v39 }
 0x25d   :  { %v943_v41 = vpop.permute.xlu0 %942 }
 0x25e   :  { %1260 = vmatmul.msk.f32.vlgmr.msrb.gmra.mxu3 %vm115_vm2, %v1361_v40  ;;  %963 = vmatpush.msrb.mxu1 %v943_v41 }
 0x25f   :  { %1261 = vmatmul.msk.f32.vlgmr.msrb.gmra.mxu1 %vm115_vm2, %v1351_v13 }
 0x260   :  { %909 = vadd.xlane.f32.xlu2 %v908_v43  ;;  %1093 = vmatpush.msra.mxu1 %v1073_v42 }
 0x266   :  { %1266 = vmatmul.msk.f32.vlgmr.msra.gmra.mxu3 %vm115_vm2, %v1355_v33 }
 0x27a   :  { %v1031_v44 = vpop.xlane.xlu1 %1030 }
 0x27b   :  { %v1033_v45 = vsub.f32 %v1618_v10, %v1031_v44 }
 0x27d   :  { %v1036_v46 = vmul.f32 1.442695, %v1033_v45 }
 0x27f   :  { %1362 = vpow2.f32 %v1036_v46 }
 0x280   :  { %v159_v48 = vpop.f32.mrf.mxu3 }
 0x285   :  { %v1363_v47 = vpop.eup %1362 }
 0x286   :  { %1267 = vmatmul.msk.f32.vlgmr.msra.gmra.mxu1 %vm115_vm2, %v1363_v47  ;;  %v1041_v49 = vsel %vm115_vm2, %v1363_v47, 0.0 }
 0x287   :  { %v263_v50 = vpop.xlane.xlu1 %262  ;;  %1042 = vadd.xlane.f32.xlu1 %v1041_v49  ;;  %v1178_v49 = vld [vmem:[%s1716_s3 + $0x18] sm:$0xff] }
 0x288   :  { %1364 = vrcp.f32 %v263_v50  ;;  %v130_v51 = vpop.xlane.xlu2 %129  ;;  %v133_v52 = vpop.xlane.xlu0 %132  ;;  %v1177_v50 = vld [vmem:[%s1716_s3 + $0x10] sm:$0xff]  ;;  %1201 = vmatpush.msrb.mxu2 %v1178_v49 }
 0x289   :  { %1366 = vrcp.f32 %v130_v51  ;;  %v185_v56 = vpop.f32.mrf.mxu3  ;;  %v1176_v51 = vld [vmem:[%s1716_s3 + $0x8] sm:$0xff] }
 0x28a   :  { %1368 = vrcp.f32 %v133_v52  ;;  %1202 = vmatpush.msrb.mxu2 %v1177_v50  ;;  %v1175_v52 = vld [vmem:[%s1716_s3] sm:$0xff] }
 0x28c   :  { %1203 = vmatpush.msrb.mxu2 %v1176_v51 }
 0x28e   :  { %v1365_v53 = vpop.eup %1364  ;;  %1204 = vmatpush.msrb.mxu2 %v1175_v52 }
 0x28f   :  { %v1367_v54 = vpop.eup %1366 }
 0x290   :  { %v1369_v55 = vpop.eup %1368  ;;  %v315_v10 = vpop.f32.mrf.mxu1  ;;  %v1669_v59 = vmul.f32 %v1367_v54, %v159_v48 }
 0x291   :  { %v1671_v57 = vmul.f32 %v1369_v55, %v185_v56  ;;  %v319_v60 = vmul.f32 %v1365_v53, %v315_v10  ;;  %v260_v62 = vpop.xlane.xlu2 %259  ;;  %v289_v4 = vpop.f32.mrf.mxu3 }
 0x292   :  { %1370 = vrcp.f32 %v260_v62 }
 0x293   :  { %1104 = vrot.lane.b32.xlu0 %v319_v60, %s1419_s27 }
 0x298   :  { %v1371_v2 = vpop.eup %1370 }
 0x299   :  { %v318_v6 = vmul.f32 %v1371_v2, %v289_v4 }
 0x29a   :  { %v393_v1 = vpop.xlane.xlu2 %392 }
 0x29b   :  { %1372 = vrcp.f32 %v393_v1 }
 0x2a0   :  { %1102 = vrot.lane.b32.xlu1 %v318_v6, %s1419_s27 }
 0x2a1   :  { %v1373_v63 = vpop.eup %1372 }
 0x2a2   :  { %v390_v11 = vpop.xlane.xlu0 %389 }
 0x2a3   :  { %v445_v12 = vpop.f32.mrf.mxu1  ;;  %1374 = vrcp.f32 %v390_v11 }
 0x2a4   :  { %v449_v14 = vmul.f32 %v1373_v63, %v445_v12 }
 0x2a6   :  { %1112 = vrot.lane.b32.xlu2 %v449_v14, %s1420_s28 }
 0x2a9   :  { %v1375_v16 = vpop.eup %1374 }
 0x2aa   :  { %v523_v15 = vpop.xlane.xlu0 %522 }
 0x2ab   :  { %1376 = vrcp.f32 %v523_v15 }
 0x2b1   :  { %v419_v58 = vpop.f32.mrf.mxu3  ;;  %v1377_v20 = vpop.eup %1376 }
 0x2b2   :  { %v448_v18 = vmul.f32 %v1375_v16, %v419_v58  ;;  %v520_v19 = vpop.xlane.xlu1 %519 }
 0x2b3   :  { %v575_v21 = vpop.f32.mrf.mxu1  ;;  %1378 = vrcp.f32 %v520_v19 }
 0x2b4   :  { %v579_v22 = vmul.f32 %v1377_v20, %v575_v21  ;;  %1110 = vrot.lane.b32.xlu2 %v448_v18, %s1420_s28 }
 0x2b6   :  { %1120 = vrot.lane.b32.xlu1 %v579_v22, %s1421_s29 }
 0x2b9   :  { %v1379_v24 = vpop.eup %1378 }
 0x2ba   :  { %v653_v23 = vpop.xlane.xlu1 %652 }
 0x2be   :  { %v913_v9 = vpop.xlane.xlu0 %912 }
 0x2c1   :  { %v549_v5 = vpop.f32.mrf.mxu3 }
 0x2c2   :  { %v578_v17 = vmul.f32 %v1379_v24, %v549_v5  ;;  %v650_v25 = vpop.xlane.xlu1 %649 }
 0x2c3   :  { %1380 = vrcp.f32 %v650_v25  ;;  %v705_v31 = vpop.f32.mrf.mxu1 }
 0x2c4   :  { %1118 = vrot.lane.b32.xlu0 %v578_v17, %s1421_s29 }
 0x2c6   :  { %v1040_v32 = vpop.xlane.xlu0 %1039 }
 0x2c9   :  { %v1381_v8 = vpop.eup %1380 }
 0x2ca   :  { %v780_v27 = vpop.xlane.xlu1 %779 }
 0x2cb   :  { %v783_v26 = vpop.xlane.xlu2 %782  ;;  %1382 = vrcp.f32 %v780_v27 }
 0x2cc   :  { %1384 = vrcp.f32 %v653_v23 }
 0x2d1   :  { %v679_v13 = vpop.f32.mrf.mxu3  ;;  %v1383_v30 = vpop.eup %1382 }
 0x2d2   :  { %v708_v28 = vmul.f32 %v1381_v8, %v679_v13  ;;  %v1385_v33 = vpop.eup %1384 }
 0x2d3   :  { %v910_v29 = vpop.xlane.xlu2 %909  ;;  %v709_v36 = vmul.f32 %v1385_v33, %v705_v31  ;;  %v835_v7 = vpop.f32.mrf.mxu1 }
 0x2d4   :  { %1126 = vrot.lane.b32.xlu1 %v708_v28, %s1422_s30  ;;  %1386 = vrcp.f32 %v910_v29 }
 0x2d5   :  { %1388 = vrcp.f32 %v1040_v32 }
 0x2d6   :  { %1390 = vrcp.f32 %v783_v26 }
 0x2d7   :  { %1392 = vrcp.f32 %v913_v9 }
 0x2d9   :  { %v809_v61 = vpop.f32.mrf.mxu3 }
 0x2da   :  { %v838_v0 = vmul.f32 %v1383_v30, %v809_v61  ;;  %v1387_v34 = vpop.eup %1386 }
 0x2db   :  { %v1389_v38 = vpop.eup %1388 }
 0x2dc   :  { %1134 = vrot.lane.b32.xlu0 %v838_v0, %s1423_s6  ;;  %v1391_v3 = vpop.eup %1390  ;;  %v965_v42 = vpop.f32.mrf.mxu1 }
 0x2dd   :  { %v839_v40 = vmul.f32 %v1391_v3, %v835_v7  ;;  %v1393_v43 = vpop.eup %1392 }
 0x2de   :  { %v969_v44 = vmul.f32 %v1393_v43, %v965_v42 }
 0x2e1   :  { %v939_v35 = vpop.f32.mrf.mxu3 }
 0x2e2   :  { %v968_v37 = vmul.f32 %v1387_v34, %v939_v35 }
 0x2e4   :  { %1142 = vrot.lane.b32.xlu2 %v968_v37, %s1424_s1  ;;  %1128 = vrot.lane.b32.xlu0 %v709_v36, %s1422_s30 }
 0x2e9   :  { %v1069_v39 = vpop.f32.mrf.mxu3 }
 0x2ea   :  { %v1098_v41 = vmul.f32 %v1389_v38, %v1069_v39 }
 0x2ec   :  { %1150 = vrot.lane.b32.xlu1 %v1098_v41, %s1425_s7  ;;  %1136 = vrot.lane.b32.xlu2 %v839_v40, %s1423_s6 }
 0x2f4   :  { %1144 = vrot.lane.b32.xlu1 %v969_v44, %s1424_s1 }
 0x2fa   :  { %v1043_v45 = vpop.xlane.xlu1 %1042 }
 0x2fb   :  { %1394 = vrcp.f32 %v1043_v45 }
 0x300   :  { %v1113_v55 = vpop.permute.xlu2 %1112 }
 0x301   :  { %v1395_v46 = vpop.eup %1394 }
 0x303   :  { %v1095_v47 = vpop.f32.mrf.mxu1 }
 0x304   :  { %v1099_v48 = vmul.f32 %v1395_v46, %v1095_v47 }
 0x305   :  { %v1105_v54 = vpop.permute.xlu0 %1104 }
 0x306   :  { %1152 = vrot.lane.b32.xlu0 %v1099_v48, %s1425_s7  ;;  %v1157_v16 = vsel %vm63_vm1, %v1671_v57, %v1105_v54  ;;  %v1331_v57 = vld [vmem:[%s1715_s4] ss:$0 sm:$0xff] }
 0x307   :  { %v1159_v18 = vsel %vm115_vm2, %v1157_v16, %v1113_v55 }
 0x30e   :  { %v1111_v60 = vpop.permute.xlu2 %1110 }
 0x312   :  { %v1103_v53 = vpop.permute.xlu1 %1102 }
 0x313   :  { %v1156_v62 = vsel %vm63_vm1, %v1669_v59, %v1103_v53 }
 0x314   :  { %v1158_v2 = vsel %vm115_vm2, %v1156_v62, %v1111_v60 }
 0x328   :  { %v1121_v56 = vpop.permute.xlu1 %1120 }
 0x329   :  { %v1162_v19 = vsel %vm1160_vm4, %v1159_v18, %v1121_v56 }
 0x336   :  { %v1119_v10 = vpop.permute.xlu0 %1118 }
 0x337   :  { %v1161_v6 = vsel %vm1160_vm4, %v1158_v2, %v1119_v10 }
 0x33e   :  { %v1143_v12 = vpop.permute.xlu2 %1142 }
 0x346   :  { %v1127_v1 = vpop.permute.xlu1 %1126  ;;  %v1137_v22 = vpop.permute.xlu2 %1136 }
 0x347   :  { %v1164_v11 = vsel %vm1163_vm3, %v1161_v6, %v1127_v1 }
 0x34e   :  { %v1135_v4 = vpop.permute.xlu0 %1134 }
 0x34f   :  { %v1167_v63 = vsel %vm1166_vm5, %v1164_v11, %v1135_v4 }
 0x350   :  { %v1170_v15 = vsel %vm1169_vm6, %v1167_v63, %v1143_v12 }
 0x356   :  { %v1129_v58 = vpop.permute.xlu0 %1128 }
 0x357   :  { %v1165_v20 = vsel %vm1163_vm3, %v1162_v19, %v1129_v58 }
 0x358   :  { %v1168_v23 = vsel %vm1166_vm5, %v1165_v20, %v1137_v22 }
 0x35e   :  { %v1151_v14 = vpop.permute.xlu1 %1150 }
 0x35f   :  { %v1173_v59 = vsel %vm1172_vm7, %v1170_v15, %v1151_v14 }
 0x360   :  { %1268 = vmatmul.msk.f32.vlgmr.msrb.gmra.mxu2 %vm30_vm0, %v1173_v59 }
 0x366   :  { %v1145_v21 = vpop.permute.xlu1 %1144 }
 0x367   :  { %v1171_v24 = vsel %vm1169_vm6, %v1168_v23, %v1145_v21 }
 0x378   :  { %v1153_v5 = vpop.permute.xlu0 %1152 }
 0x379   :  { %v1174_v17 = vsel %vm1172_vm7, %v1171_v24, %v1153_v5 }
 0x37a   :  { %1269 = vmatmul.msk.f32.gmra.mxu2 %vm30_vm0, %v1174_v17 }
 0x3e3   :  { %v1206_v25 = vpop.f32.mrf.mxu2 }
 0x3e4   :  { %v1207_v26 = vadd.f32 %v1331_v57, %v1206_v25 }
 0x3e6   :  { %1212 = vst.msk [vmem:[%s1717_s5] sm:$0xff] %vm1163_vm3, %v1207_v26 }
 0x3fd   :  { %v1209_v27 = vpop.f32.mrf.mxu2 }
 0x3fe   :  { %v1210_v8 = vadd.f32 %v1331_v57, %v1209_v27 }
 0x400   :  { %1213 = vst.msk [vmem:[%s1717_s5 + $0x8] sm:$0xff] %vm1163_vm3, %v1210_v8 }

</bundles_post_ra>
